<compile_context>
chip_gen: v6e
topology: v6e:2x2x1
jax: 0.10.0
libtpu: 0.0.40
codegen_flags: <defaults>
</compile_context>

<pallas_src>
import jax
import jax.numpy as jnp
from jax.experimental import pallas as pl
from jax.experimental.pallas import tpu as pltpu


def gating_mlp_kernel(pooled_ref, w1_ref, w2g_ref, b_ref, out_ref):
    """Fused fc1 -> ReLU -> fc2 -> ReLU -> fc_gate -> softmax on one M-block."""
    hid = w1_ref.shape[1]

    # Static Ref slices (zero-cost views; every cut lands on a 128-lane boundary).
    b1 = b_ref[:, :hid]                  # (1, hid)
    b2 = b_ref[:, hid:2 * hid]           # (1, hid)
    bg = b_ref[:, 2 * hid:]              # (1, nt_pad)
    w2 = w2g_ref[:, :hid]                # (hid, hid)
    wg = w2g_ref[:, hid:]                # (hid, nt_pad)

    pooled = pooled_ref[...]             # (bm, C) -- C already on lanes

    # fc1 + ReLU
    h1 = jnp.dot(pooled, w1_ref[...], preferred_element_type=jnp.float32)
    h1 = jnp.maximum(h1 + b1, 0.0)       # (bm, hid)

    # (dropout = identity in eval mode)

    # fc2 + ReLU
    h2 = jnp.dot(h1, w2, preferred_element_type=jnp.float32)
    h2 = jnp.maximum(h2 + b2, 0.0)       # (bm, hid)

    # fc_gate (padded to nt_pad lanes; pad logits carry a -1e30 bias so they
    # contribute exp(..) == 0 to the softmax).
    logits = jnp.dot(h2, wg, preferred_element_type=jnp.float32) + bg  # (bm, nt_pad)

    # softmax over the (padded) task axis
    m = jnp.max(logits, axis=-1, keepdims=True)
    e = jnp.exp(logits - m)
    s = jnp.sum(e, axis=-1, keepdims=True)
    out_ref[...] = e * pl.reciprocal(s, approx=False)


def gating_network(x_nchw, params, num_tasks, *, block_m=256):
    """x_nchw: (B, C, H, W) float32. Returns (B, num_tasks) softmax gates."""
    B, C, H, W = x_nchw.shape
    w1, w2g, biases = params
    hid = w1.shape[1]
    nt_pad = w2g.shape[1] - hid

    # Packing invariant: the in-kernel Ref slices are only free because every
    # cut lands on a 128-lane tile boundary.
    assert hid % 128 == 0, "hidden_dim must be a multiple of 128 (pad it)"
    assert nt_pad % 128 == 0, "padded task width must be a multiple of 128"
    assert C % 128 == 0, "feature_dim must be a multiple of 128 for lane-dense matmuls"

    # Global average pool in the wrapper: mem-bound streaming work XLA already
    # does at HBM roofline; result is lane-major (C on lanes) for fc1.
    pooled = jnp.mean(x_nchw, axis=(2, 3)).astype(jnp.float32)     # (B, C)

    # Grid over the batch axis so batched callers fill the MXU and shard across
    # v7x's two TensorCores.  Small batches use one full-array block.
    if B <= block_m:
        bm, b_pad = B, B
    else:
        bm = block_m
        b_pad = pl.cdiv(B, bm) * bm
    if b_pad != B:
        pooled = jnp.pad(pooled, ((0, b_pad - B), (0, 0)))
    grid = (b_pad // bm,)

    out_pad = pl.pallas_call(
        gating_mlp_kernel,
        out_shape=jax.ShapeDtypeStruct((b_pad, nt_pad), jnp.float32),
        grid_spec=pltpu.PrefetchScalarGridSpec(
            num_scalar_prefetch=0,
            grid=grid,
            in_specs=[
                pl.BlockSpec((bm, C), lambda i: (i, 0)),
                # Constant index_map -> weights fetched once, resident across steps.
                pl.BlockSpec((C, hid), lambda i: (0, 0)),
                pl.BlockSpec((hid, hid + nt_pad), lambda i: (0, 0)),
                pl.BlockSpec((1, 2 * hid + nt_pad), lambda i: (0, 0)),
            ],
            out_specs=pl.BlockSpec((bm, nt_pad), lambda i: (i, 0)),
        ),
        compiler_params=pltpu.CompilerParams(
            dimension_semantics=("parallel",),
        ),
    )(pooled, w1, w2g, biases)

    return out_pad[:B, :num_tasks]


def init_params(key, feature_dim, hidden_dim, num_tasks, nt_pad):
    k1, k2, k3 = jax.random.split(key, 3)
    w1 = jax.random.normal(k1, (feature_dim, hidden_dim), jnp.float32) * 0.02
    b1 = jnp.zeros((hidden_dim,), jnp.float32)
    w2 = jax.random.normal(k2, (hidden_dim, hidden_dim), jnp.float32) * 0.02
    b2 = jnp.zeros((hidden_dim,), jnp.float32)
    wg = jax.random.normal(k3, (hidden_dim, num_tasks), jnp.float32) * 0.02
    bg = jnp.zeros((num_tasks,), jnp.float32)

    assert hidden_dim % 128 == 0 and nt_pad % 128 == 0, (
        "pack boundaries must sit on 128-lane tiles")

    # Pad the gate head to nt_pad lanes; padded columns get weight 0 and a very
    # negative bias so they vanish under softmax.
    wg_pad = jnp.zeros((hidden_dim, nt_pad), jnp.float32).at[:, :num_tasks].set(wg)
    bg_pad = jnp.full((nt_pad,), -1e30, jnp.float32).at[:num_tasks].set(bg)

    # Pack weights/biases to minimize DMA count (3 tensor inputs besides pooled x).
    w2g = jnp.concatenate([w2, wg_pad], axis=1)                    # (hid, hid+nt_pad)
    biases = jnp.concatenate([b1, b2, bg_pad])[None, :]            # (1, 2*hid+nt_pad)

    packed = (w1, w2g, biases)
    raw = (w1, b1, w2, b2, wg, bg)
    return packed, raw


def reference(x_nchw, raw_params):
    w1, b1, w2, b2, wg, bg = raw_params
    pooled = jnp.mean(x_nchw, axis=(2, 3))                         # (B, C)
    h1 = jnp.maximum(pooled @ w1 + b1, 0.0)
    h2 = jnp.maximum(h1 @ w2 + b2, 0.0)
    logits = h2 @ wg + bg
    return jax.nn.softmax(logits, axis=1)


if __name__ == "__main__":
    # Small shapes consistent with the module's forward pass.
    B, C, H, W = 2, 256, 8, 8          # feature_dim = C = 256
    hidden_dim, num_tasks = 128, 2
    NT_PAD = 128

    key = jax.random.PRNGKey(0)
    kx, kp, kx2 = jax.random.split(key, 3)
    x = jax.random.normal(kx, (B, C, H, W), jnp.float32)

    params, raw_params = init_params(kp, C, hidden_dim, num_tasks, NT_PAD)

    gates = jax.block_until_ready(gating_network(x, params, num_tasks))
    ref = reference(x, raw_params)
    assert gates.shape == (B, num_tasks)
    assert jnp.allclose(gates, ref, atol=1e-5, rtol=1e-5), (gates, ref)
    assert jnp.allclose(jnp.sum(gates, axis=1), 1.0, atol=1e-5)

    # Exercise the multi-block / "parallel" batch path (what batched callers use
    # to fill the MXU and both v7x TensorCores), including a padded last block.
    B2 = 40
    x2 = jax.random.normal(kx2, (B2, C, H, W), jnp.float32)
    gates2 = jax.block_until_ready(
        gating_network(x2, params, num_tasks, block_m=16))
    ref2 = reference(x2, raw_params)
    assert gates2.shape == (B2, num_tasks)
    assert jnp.allclose(gates2, ref2, atol=1e-5, rtol=1e-5), (gates2, ref2)
    assert jnp.allclose(jnp.sum(gates2, axis=1), 1.0, atol=1e-5)

    print("KERNEL_OK")
</pallas_src>

<mosaic_0001>
module attributes {stable_mosaic.version = 11 : i64} {
  func.func @gating_mlp_kernel(%arg0: i32, %arg1: memref<2x256xf32, #tpu.memory_space<vmem>>, %arg2: memref<256x128xf32, #tpu.memory_space<vmem>>, %arg3: memref<128x256xf32, #tpu.memory_space<vmem>>, %arg4: memref<1x384xf32, #tpu.memory_space<vmem>>, %arg5: memref<2x128xf32, #tpu.memory_space<vmem>>) attributes {dimension_semantics = [#tpu.dimension_semantics<parallel>], iteration_bounds = array<i64: 1>, scalar_prefetch = 0 : i64, scratch_operands = 0 : i64, tpu.core_type = #tpu.core_type<tc>, window_params = [{transform_indices = @transform_0, window_bounds = array<i64: 2, 256>}, {pipeline_mode = #tpu.pipeline_mode<synchronous>, transform_indices = @transform_1, window_bounds = array<i64: 256, 128>}, {pipeline_mode = #tpu.pipeline_mode<synchronous>, transform_indices = @transform_2, window_bounds = array<i64: 128, 256>}, {pipeline_mode = #tpu.pipeline_mode<synchronous>, transform_indices = @transform_3, window_bounds = array<i64: 1, 384>}, {transform_indices = @transform_4, window_bounds = array<i64: 2, 128>}]} {
    %c0 = arith.constant 0 : index
    %c0_0 = arith.constant 0 : index
    %0 = vector.load %arg4[%c0, %c0_0] : memref<1x384xf32, #tpu.memory_space<vmem>>, vector<1x128xf32>
    %c0_1 = arith.constant 0 : index
    %c128 = arith.constant 128 : index
    %1 = vector.load %arg4[%c0_1, %c128] : memref<1x384xf32, #tpu.memory_space<vmem>>, vector<1x128xf32>
    %c0_2 = arith.constant 0 : index
    %c256 = arith.constant 256 : index
    %2 = vector.load %arg4[%c0_2, %c256] : memref<1x384xf32, #tpu.memory_space<vmem>>, vector<1x128xf32>
    %c0_3 = arith.constant 0 : index
    %c0_4 = arith.constant 0 : index
    %3 = vector.load %arg3[%c0_3, %c0_4] : memref<128x256xf32, #tpu.memory_space<vmem>>, vector<128x128xf32>
    %c0_5 = arith.constant 0 : index
    %c128_6 = arith.constant 128 : index
    %4 = vector.load %arg3[%c0_5, %c128_6] : memref<128x256xf32, #tpu.memory_space<vmem>>, vector<128x128xf32>
    %c0_7 = arith.constant 0 : index
    %c0_8 = arith.constant 0 : index
    %5 = vector.load %arg1[%c0_7, %c0_8] : memref<2x256xf32, #tpu.memory_space<vmem>>, vector<2x256xf32>
    %c0_9 = arith.constant 0 : index
    %c0_10 = arith.constant 0 : index
    %6 = vector.load %arg2[%c0_9, %c0_10] : memref<256x128xf32, #tpu.memory_space<vmem>>, vector<256x128xf32>
    %cst = arith.constant dense<0.000000e+00> : vector<2x128xf32>
    %7 = tpu.matmul %5, %6, %cst {dimension_numbers = #tpu.dot_dimension_numbers<[1], [0], [0], [1], [0, 0, 1, 1], [], []>} : vector<2x256xf32>, vector<256x128xf32>, vector<2x128xf32> -> vector<2x128xf32>
    %8 = vector.broadcast %0 : vector<1x128xf32> to vector<2x128xf32>
    %9 = arith.addf %7, %8 : vector<2x128xf32>
    %cst_11 = arith.constant 0.000000e+00 : f32
    %10 = vector.broadcast %cst_11 : f32 to vector<2x128xf32>
    %11 = arith.maximumf %9, %10 : vector<2x128xf32>
    %cst_12 = arith.constant dense<0.000000e+00> : vector<2x128xf32>
    %12 = tpu.matmul %11, %3, %cst_12 {dimension_numbers = #tpu.dot_dimension_numbers<[1], [0], [0], [1], [0, 0, 1, 1], [], []>} : vector<2x128xf32>, vector<128x128xf32>, vector<2x128xf32> -> vector<2x128xf32>
    %13 = vector.broadcast %1 : vector<1x128xf32> to vector<2x128xf32>
    %14 = arith.addf %12, %13 : vector<2x128xf32>
    %cst_13 = arith.constant 0.000000e+00 : f32
    %15 = vector.broadcast %cst_13 : f32 to vector<2x128xf32>
    %16 = arith.maximumf %14, %15 : vector<2x128xf32>
    %cst_14 = arith.constant dense<0.000000e+00> : vector<2x128xf32>
    %17 = tpu.matmul %16, %4, %cst_14 {dimension_numbers = #tpu.dot_dimension_numbers<[1], [0], [0], [1], [0, 0, 1, 1], [], []>} : vector<2x128xf32>, vector<128x128xf32>, vector<2x128xf32> -> vector<2x128xf32>
    %18 = vector.broadcast %2 : vector<1x128xf32> to vector<2x128xf32>
    %19 = arith.addf %17, %18 : vector<2x128xf32>
    %cst_15 = arith.constant dense<0xFF800000> : vector<2xf32>
    %20 = vector.multi_reduction <maximumf>, %19, %cst_15 [1] : vector<2x128xf32> to vector<2xf32>
    %21 = vector.shape_cast %20 : vector<2xf32> to vector<2x1xf32>
    %22 = vector.broadcast %21 : vector<2x1xf32> to vector<2x128xf32>
    %23 = arith.subf %19, %22 : vector<2x128xf32>
    %24 = math.exp %23 : vector<2x128xf32>
    %cst_16 = arith.constant dense<0.000000e+00> : vector<2xf32>
    %25 = vector.multi_reduction <add>, %24, %cst_16 [1] : vector<2x128xf32> to vector<2xf32>
    %26 = vector.shape_cast %25 : vector<2xf32> to vector<2x1xf32>
    %27 = tpu.reciprocal %26 : vector<2x1xf32> -> vector<2x1xf32>
    %28 = vector.broadcast %27 : vector<2x1xf32> to vector<2x128xf32>
    %29 = arith.mulf %24, %28 : vector<2x128xf32>
    %c0_17 = arith.constant 0 : index
    %c0_18 = arith.constant 0 : index
    %30 = vector.load %arg5[%c0_17, %c0_18] : memref<2x128xf32, #tpu.memory_space<vmem>>, vector<2x128xf32>
    tpu.vector_store %arg5[%c0_17, %c0_18], %29 {strides = array<i32>} : memref<2x128xf32, #tpu.memory_space<vmem>>, vector<2x128xf32>,
    return
  }
  func.func @transform_0(%arg0: i32) -> (i32, i32) {
    %c0_i32 = arith.constant 0 : i32
    %c0_i32_0 = arith.constant 0 : i32
    return %arg0, %c0_i32 : i32, i32
  }
  func.func @transform_1(%arg0: i32) -> (i32, i32) {
    %c0_i32 = arith.constant 0 : i32
    %c0_i32_0 = arith.constant 0 : i32
    %c0_i32_1 = arith.constant 0 : i32
    return %c0_i32, %c0_i32_0 : i32, i32
  }
  func.func @transform_2(%arg0: i32) -> (i32, i32) {
    %c0_i32 = arith.constant 0 : i32
    %c0_i32_0 = arith.constant 0 : i32
    %c0_i32_1 = arith.constant 0 : i32
    return %c0_i32, %c0_i32_0 : i32, i32
  }
  func.func @transform_3(%arg0: i32) -> (i32, i32) {
    %c0_i32 = arith.constant 0 : i32
    %c0_i32_0 = arith.constant 0 : i32
    %c0_i32_1 = arith.constant 0 : i32
    return %c0_i32, %c0_i32_0 : i32, i32
  }
  func.func @transform_4(%arg0: i32) -> (i32, i32) {
    %c0_i32 = arith.constant 0 : i32
    %c0_i32_0 = arith.constant 0 : i32
    return %arg0, %c0_i32 : i32, i32
  }
}

</mosaic_0001>

<bundles_post_ra>
// kernel: tpu_custom_call.1
= control target key start
LH: loop header
LB: loop body
LE: loop exit
PB: predicated region body
PF: predicated region fallthrough
CT: control target
= control target key end

     0   :  { %9 = vsyncpa [#allocation3], 0  ;;  %s733_s0 = inlined_call_operand.hbm [shape: f32[2,256], index: 0, kind: input, shape index: {}]   ;;  %s734_s1 = inlined_call_operand.hbm [shape: f32[256,128], index: 1, kind: input, shape index: {}]   ;;  %s735_s2 = inlined_call_operand.hbm [shape: f32[128,256], index: 2, kind: input, shape index: {}]   ;;  %s736_s3 = inlined_call_operand.vmem [shape: f32[1,384], index: 3, kind: input, shape index: {}]   ;;  %s737_s4 = inlined_call_operand.hbm [shape: f32[2,128], index: 4, kind: output, shape index: {}]  }
   0x1   :  { %10 = vsyncpa [#allocation6], 0 }
   0x2   :  { %11 = vsyncpa [#allocation4], 0  ;;  %s638_s15 = smov [#allocation5]  }
   0x3   :  { %s27_s16 = sshll.u32 %s638_s15, 4  ;;  %s28_s16 = int_to_ptr.vmem [resolvable:$true] %s27_s16 }
   0x4   :  { %s560_s17 = scalar_lea.vmem %s28_s16, 4096  ;;  %p565_p1 = scmp.lt.s32.totalorder %s28_s16, %s28_s16 }
   0x5   :  { %p561_p0 = scmp.ne.s32.totalorder %s28_s16, %s560_s17  ;;  %p566_p2 = scmp.lt.s32.totalorder %s560_s17, %s560_s17 }
   0x7   :  { %p567_p3 = por %p566_p2, %p565_p1 }
   0x9   :  { %p568_p4 = pnand %p567_p3, %p561_p0 }
   0xb   :  { %571 = shalt.err (!%p568_p4)
}
   0xc   :  { %s639_s18 = smov 128   ;;  %s640_s19 = smov 8  }
   0xd   :  { %33 = dma.hbm_to_vmem [thread:$0]  %s734_s1, 4096, %s28_s16, [#allocation6], %s639_s18, %s639_s18, %s640_s19  }
   0xe   :  { %s641_s22 = smov [#allocation2]   ;;  %s642_s24 = smov [#allocation7]  }
   0xf   :  { %s18_s23 = sshll.u32 %s641_s22, 4  ;;  %s39_s25 = sshll.u32 %s642_s24, 4  ;;  %s19_s23 = int_to_ptr.vmem [resolvable:$true] %s18_s23  ;;  %s40_s25 = int_to_ptr.vmem [resolvable:$true] %s39_s25 }
  0x10   :  { %s580_s26 = scalar_lea.vmem %s19_s23, 64  ;;  %p585_p6 = scmp.lt.s32.totalorder %s19_s23, %s19_s23 }
  0x11   :  { %p581_p5 = scmp.ne.s32.totalorder %s19_s23, %s580_s26  ;;  %p586_p7 = scmp.lt.s32.totalorder %s580_s26, %s580_s26 }
  0x13   :  { %p587_p8 = por %p586_p7, %p585_p6 }
  0x15   :  { %p588_p9 = pnand %p587_p8, %p581_p5 }
  0x17   :  { %591 = shalt.err (!%p588_p9)
}
  0x18   :  { %21 = dma.hbm_to_vmem [thread:$0]  %s733_s0, 64, %s19_s23, [#allocation3]  }
  0x19   :  { %s600_s29 = scalar_lea.vmem %s40_s25, 4096  ;;  %p605_p11 = scmp.lt.s32.totalorder %s40_s25, %s40_s25 }
  0x1a   :  { %p601_p10 = scmp.ne.s32.totalorder %s40_s25, %s600_s29  ;;  %p606_p12 = scmp.lt.s32.totalorder %s600_s29, %s600_s29 }
  0x1c   :  { %p607_p13 = por %p606_p12, %p605_p11 }
  0x1e   :  { %p608_p0 = pnand %p607_p13, %p601_p10 }
  0x20   :  { %611 = shalt.err (!%p608_p0)
}
  0x21   :  { %s643_s1 = smov 256   ;;  %s644_s30 = smov 16  }
  0x22   :  { %45 = dma.hbm_to_vmem [thread:$0]  %s735_s2, 4096, %s40_s25, [#allocation6], %s643_s1, %s643_s1, %s644_s30  }
  0x23   :  { %632 = dma.done.wait [#allocation3], 64  }
  0x24   :  { %633 = vsyncadd [#allocation3], 4294967232 }
  0x25   :  { %634 = dma.done.wait [#allocation6], 8192  }
  0x26   :  { %635 = vsyncadd [#allocation6], 4294959104  ;;  %v645_v0 = vmov 0.0   ;;  %v124_v1 = vld [vmem:[#allocation5 + $0xf8] sm:$0xff]  ;;  %v123_v3 = vld [vmem:[#allocation5 + $0xf0] sm:$0xff]  ;;  %vm646_vm0 = vmmov 0  }
  0x27   :  { %468 = vmatprep.subr.mxu1 %v645_v0  ;;  %v108_v2 = vld [vmem:[#allocation5 + $0x78] sm:$0xff]  ;;  %399 = vmatprep.subr.mxu0 %v124_v1  ;;  %v107_v4 = vld [vmem:[#allocation5 + $0x70] sm:$0xff]  ;;  %v122_v5 = vld [vmem:[#allocation5 + $0xe8] sm:$0xff]  ;;  %vm366_vm1 = vcmask 1041408   ;;  %s647_s11 = smov [#allocation8]  }
  0x28   :  { %400 = vmatpush3.msra.mxu0 %v108_v2  ;;  %v106_v6 = vld [vmem:[#allocation5 + $0x68] sm:$0xff]  ;;  %v121_v7 = vld [vmem:[#allocation5 + $0xe0] sm:$0xff]  ;;  %v120_v9 = vld [vmem:[#allocation5 + $0xd8] sm:$0xff]  ;;  %500 = vmatprep.mubr.msk.f32.mxu1 %vm646_vm0, %v645_v0  ;;  %s385_s12 = sshll.u32 %s647_s11, 4  ;;  %s386_s12 = int_to_ptr.vmem [resolvable:$true] %s385_s12 }
  0x29   :  { %401 = vmatprep.subr.mxu0 %v123_v3  ;;  %v105_v8 = vld [vmem:[#allocation5 + $0x60] sm:$0xff]  ;;  %v104_v10 = vld [vmem:[#allocation5 + $0x58] sm:$0xff]  ;;  %v119_v11 = vld [vmem:[#allocation5 + $0xd0] sm:$0xff]  ;;  %p617_p2 = scmp.lt.s32.totalorder %s386_s12, %s386_s12 }
  0x2a   :  { %402 = vmatpush3.msra.mxu0 %v107_v4  ;;  %v103_v12 = vld [vmem:[#allocation5 + $0x50] sm:$0xff]  ;;  %v118_v13 = vld [vmem:[#allocation5 + $0xc8] sm:$0xff]  ;;  %v683_v14 = vld.sshfl [vmem:[#allocation2] sm:$0x33 pattern:$0x76325410] }
  0x2b   :  { %403 = vmatprep.subr.mxu0 %v122_v5  ;;  %v102_v15 = vld [vmem:[#allocation5 + $0x48] sm:$0xff]  ;;  %v139_v16 = vcombine.high %v683_v14, %v683_v14  ;;  %v75_v17 = vld [vmem:[#allocation7 + $0xf0] sm:$0xff]  ;;  %v117_v18 = vld [vmem:[#allocation5 + $0xc0] sm:$0xff] }
  0x2c   :  { %404 = vmatpush3.msra.mxu0 %v106_v6  ;;  %469 = vmatpush3.msra.mxu1 %v75_v17  ;;  %v74_v19 = vld [vmem:[#allocation7 + $0xe0] sm:$0xff]  ;;  %v116_v21 = vld [vmem:[#allocation5 + $0xb8] sm:$0xff]  ;;  %v73_v22 = vld [vmem:[#allocation7 + $0xd0] sm:$0xff] }
  0x2d   :  { %405 = vmatprep.subr.mxu0 %v121_v7  ;;  %v101_v20 = vld [vmem:[#allocation5 + $0x40] sm:$0xff]  ;;  %206 = vmatprep.mubr.f32.mxu0 %v139_v16  ;;  %v100_v23 = vld [vmem:[#allocation5 + $0x38] sm:$0xff]  ;;  %v115_v24 = vld [vmem:[#allocation5 + $0xb0] sm:$0xff] }
  0x2e   :  { %406 = vmatpush3.msra.mxu0 %v105_v8  ;;  %470 = vmatprep.subr.mxu1 %v645_v0  ;;  %v72_v25 = vld [vmem:[#allocation7 + $0xc0] sm:$0xff]  ;;  %v99_v26 = vld [vmem:[#allocation5 + $0x30] sm:$0xff]  ;;  %v114_v27 = vld [vmem:[#allocation5 + $0xa8] sm:$0xff] }
  0x2f   :  { %407 = vmatprep.subr.mxu0 %v120_v9  ;;  %471 = vmatpush3.msra.mxu1 %v74_v19  ;;  %v71_v28 = vld [vmem:[#allocation7 + $0xb0] sm:$0xff]  ;;  %v98_v29 = vld [vmem:[#allocation5 + $0x28] sm:$0xff]  ;;  %v113_v30 = vld [vmem:[#allocation5 + $0xa0] sm:$0xff] }
  0x30   :  { %408 = vmatpush3.msra.mxu0 %v104_v10  ;;  %472 = vmatprep.subr.mxu1 %v645_v0  ;;  %v70_v31 = vld [vmem:[#allocation7 + $0xa0] sm:$0xff]  ;;  %v112_v33 = vld [vmem:[#allocation5 + $0x98] sm:$0xff]  ;;  %v69_v34 = vld [vmem:[#allocation7 + $0x90] sm:$0xff] }
  0x31   :  { %409 = vmatprep.subr.mxu0 %v119_v11  ;;  %473 = vmatpush3.msra.mxu1 %v73_v22  ;;  %v97_v32 = vld [vmem:[#allocation5 + $0x20] sm:$0xff]  ;;  %v96_v35 = vld [vmem:[#allocation5 + $0x18] sm:$0xff]  ;;  %v111_v36 = vld [vmem:[#allocation5 + $0x90] sm:$0xff] }
  0x32   :  { %410 = vmatpush3.msra.mxu0 %v103_v12  ;;  %474 = vmatprep.subr.mxu1 %v645_v0  ;;  %v68_v37 = vld [vmem:[#allocation7 + $0x80] sm:$0xff]  ;;  %v95_v38 = vld [vmem:[#allocation5 + $0x10] sm:$0xff]  ;;  %v110_v39 = vld [vmem:[#allocation5 + $0x88] sm:$0xff] }
  0x33   :  { %411 = vmatprep.subr.mxu0 %v118_v13  ;;  %475 = vmatpush3.msra.mxu1 %v72_v25  ;;  %v67_v40 = vld [vmem:[#allocation7 + $0x70] sm:$0xff]  ;;  %v94_v41 = vld [vmem:[#allocation5 + $0x8] sm:$0xff]  ;;  %v109_v42 = vld [vmem:[#allocation5 + $0x80] sm:$0xff] }
  0x34   :  { %412 = vmatpush3.msra.mxu0 %v102_v15  ;;  %476 = vmatprep.subr.mxu1 %v645_v0  ;;  %v66_v43 = vld [vmem:[#allocation7 + $0x60] sm:$0xff]  ;;  %v65_v45 = vld [vmem:[#allocation7 + $0x50] sm:$0xff]  ;;  %v91_v51 = vld [vmem:[#allocation7 + $0xf8] sm:$0xff] }
  0x35   :  { %413 = vmatprep.subr.mxu0 %v117_v18  ;;  %477 = vmatpush3.msra.mxu1 %v71_v28  ;;  %v93_v44 = vld [vmem:[#allocation5] sm:$0xff]  ;;  %v63_v47 = vld [vmem:[#allocation7 + $0x30] sm:$0xff]  ;;  %v90_v52 = vld [vmem:[#allocation7 + $0xe8] sm:$0xff] }
  0x36   :  { %414 = vmatpush3.msra.mxu0 %v101_v20  ;;  %478 = vmatprep.subr.mxu1 %v645_v0  ;;  %v64_v46 = vld [vmem:[#allocation7 + $0x40] sm:$0xff]  ;;  %v61_v49 = vld [vmem:[#allocation7 + $0x10] sm:$0xff]  ;;  %v89_v53 = vld [vmem:[#allocation7 + $0xd8] sm:$0xff] }
  0x37   :  { %415 = vmatprep.subr.mxu0 %v116_v21  ;;  %479 = vmatpush3.msra.mxu1 %v70_v31  ;;  %v62_v48 = vld [vmem:[#allocation7 + $0x20] sm:$0xff]  ;;  %v88_v54 = vld [vmem:[#allocation7 + $0xc8] sm:$0xff]  ;;  %v87_v55 = vld [vmem:[#allocation7 + $0xb8] sm:$0xff] }
  0x38   :  { %416 = vmatpush3.msra.mxu0 %v100_v23  ;;  %480 = vmatprep.subr.mxu1 %v645_v0  ;;  %v60_v50 = vld [vmem:[#allocation7] sm:$0xff]  ;;  %v86_v56 = vld [vmem:[#allocation7 + $0xa8] sm:$0xff]  ;;  %v85_v57 = vld [vmem:[#allocation7 + $0x98] sm:$0xff] }
  0x39   :  { %417 = vmatprep.subr.mxu0 %v115_v24  ;;  %481 = vmatpush3.msra.mxu1 %v69_v34  ;;  %v84_v58 = vld [vmem:[#allocation7 + $0x88] sm:$0xff]  ;;  %v83_v59 = vld [vmem:[#allocation7 + $0x78] sm:$0xff] }
  0x3a   :  { %418 = vmatpush3.msra.mxu0 %v99_v26  ;;  %482 = vmatprep.subr.mxu1 %v645_v0  ;;  %v82_v60 = vld [vmem:[#allocation7 + $0x68] sm:$0xff]  ;;  %v81_v61 = vld [vmem:[#allocation7 + $0x58] sm:$0xff] }
  0x3b   :  { %419 = vmatprep.subr.mxu0 %v114_v27  ;;  %483 = vmatpush3.msra.mxu1 %v68_v37  ;;  %v80_v62 = vld [vmem:[#allocation7 + $0x48] sm:$0xff]  ;;  %v79_v63 = vld [vmem:[#allocation7 + $0x38] sm:$0xff] }
  0x3c   :  { %420 = vmatpush3.msra.mxu0 %v98_v29  ;;  %484 = vmatprep.subr.mxu1 %v645_v0  ;;  %v395_v2 = vld [vmem:[%s736_s3] ss:$0 sm:$0xff]  ;;  %v78_v7 = vld [vmem:[#allocation7 + $0x28] sm:$0xff]  ;;  %v397_v10 = vld [vmem:[%s736_s3 + $0x1] ss:$0 sm:$0xff] }
  0x3d   :  { %421 = vmatprep.subr.mxu0 %v113_v30  ;;  %485 = vmatpush3.msra.mxu1 %v67_v40  ;;  %v77_v8 = vld [vmem:[#allocation7 + $0x18] sm:$0xff]  ;;  %v76_v9 = vld [vmem:[#allocation7 + $0x8] sm:$0xff] }
  0x3e   :  { %422 = vmatpush3.msra.mxu0 %v97_v32  ;;  %486 = vmatprep.subr.mxu1 %v645_v0  ;;  %v398_v15 = vld [vmem:[%s736_s3 + $0x2] ss:$0 sm:$0xff]  ;;  %s612_s3 = scalar_lea.vmem %s386_s12, 32 }
  0x3f   :  { %423 = vmatprep.subr.mxu0 %v112_v33  ;;  %487 = vmatpush3.msra.mxu1 %v66_v43  ;;  %p613_p1 = scmp.ne.s32.totalorder %s386_s12, %s612_s3  ;;  %p618_p3 = scmp.lt.s32.totalorder %s612_s3, %s612_s3 }
  0x40   :  { %424 = vmatpush3.msra.mxu0 %v96_v35  ;;  %488 = vmatprep.subr.mxu1 %v645_v0 }
  0x41   :  { %425 = vmatprep.subr.mxu0 %v111_v36  ;;  %489 = vmatpush3.msra.mxu1 %v65_v45  ;;  %p619_p4 = por %p618_p3, %p617_p2 }
  0x42   :  { %426 = vmatpush3.msra.mxu0 %v95_v38  ;;  %490 = vmatprep.subr.mxu1 %v645_v0 }
  0x43   :  { %427 = vmatprep.subr.mxu0 %v110_v39  ;;  %491 = vmatpush3.msra.mxu1 %v64_v46  ;;  %p620_p5 = pnand %p619_p4, %p613_p1 }
  0x44   :  { %428 = vmatpush3.msra.mxu0 %v94_v41  ;;  %492 = vmatprep.subr.mxu1 %v645_v0 }
  0x45   :  { %429 = vmatprep.subr.mxu0 %v109_v42  ;;  %493 = vmatpush3.msra.mxu1 %v63_v47 }
  0x46   :  { %430 = vmatpush3.msra.mxu0 %v93_v44  ;;  %494 = vmatprep.subr.mxu1 %v645_v0 }
  0x47   :  { %207 = vmatmul.mubr.f32.vlgmr.msra.gmra.mxu0 %v683_v14  ;;  %503 = vmatprep.subr.mxu0 %v645_v0 }
  0x48   :  { %495 = vmatpush3.msra.mxu1 %v62_v48  ;;  %535 = vmatprep.mubr.msk.f32.mxu0 %vm646_vm0, %v645_v0 }
  0x49   :  { %496 = vmatprep.subr.mxu1 %v645_v0  ;;  %504 = vmatpush3.msra.mxu0 %v91_v51 }
  0x4a   :  { %497 = vmatpush3.msra.mxu1 %v61_v49  ;;  %505 = vmatprep.subr.mxu0 %v645_v0 }
  0x4b   :  { %498 = vmatprep.subr.mxu1 %v645_v0  ;;  %506 = vmatpush3.msra.mxu0 %v90_v52 }
  0x4c   :  { %499 = vmatpush3.msra.mxu1 %v60_v50  ;;  %507 = vmatprep.subr.mxu0 %v645_v0 }
  0x4d   :  { %508 = vmatpush3.msra.mxu0 %v89_v53 }
  0x4e   :  { %509 = vmatprep.subr.mxu0 %v645_v0 }
  0x4f   :  { %510 = vmatpush3.msra.mxu0 %v88_v54 }
  0x50   :  { %511 = vmatprep.subr.mxu0 %v645_v0 }
  0x51   :  { %512 = vmatpush3.msra.mxu0 %v87_v55 }
  0x52   :  { %513 = vmatprep.subr.mxu0 %v645_v0 }
  0x53   :  { %514 = vmatpush3.msra.mxu0 %v86_v56 }
  0x54   :  { %515 = vmatprep.subr.mxu0 %v645_v0 }
  0x55   :  { %516 = vmatpush3.msra.mxu0 %v85_v57 }
  0x56   :  { %517 = vmatprep.subr.mxu0 %v645_v0 }
  0x57   :  { %518 = vmatpush3.msra.mxu0 %v84_v58 }
  0x58   :  { %519 = vmatprep.subr.mxu0 %v645_v0 }
  0x59   :  { %520 = vmatpush3.msra.mxu0 %v83_v59 }
  0x5a   :  { %521 = vmatprep.subr.mxu0 %v645_v0 }
  0x5b   :  { %522 = vmatpush3.msra.mxu0 %v82_v60 }
  0x5c   :  { %523 = vmatprep.subr.mxu0 %v645_v0 }
  0x5d   :  { %524 = vmatpush3.msra.mxu0 %v81_v61 }
  0x5e   :  { %525 = vmatprep.subr.mxu0 %v645_v0 }
  0x5f   :  { %526 = vmatpush3.msra.mxu0 %v80_v62 }
  0x60   :  { %527 = vmatprep.subr.mxu0 %v645_v0 }
  0x61   :  { %528 = vmatpush3.msra.mxu0 %v79_v63 }
  0x62   :  { %529 = vmatprep.subr.mxu0 %v645_v0 }
  0x63   :  { %530 = vmatpush3.msra.mxu0 %v78_v7 }
  0x64   :  { %531 = vmatprep.subr.mxu0 %v645_v0 }
  0x65   :  { %532 = vmatpush3.msra.mxu0 %v77_v8 }
  0x66   :  { %533 = vmatprep.subr.mxu0 %v645_v0 }
  0x67   :  { %534 = vmatpush3.msra.mxu0 %v76_v9 }
 0x107   :  { %v431_v1 = vpop.f32.mrf.mxu0 }
 0x109   :  { %v432_v3 = vpop.f32.mrf.mxu0 }
 0x10a   :  { %v433_v4 = vadd.f32 %v432_v3, %v431_v1 }
 0x10c   :  { %v209_v5 = vadd.f32 %v433_v4, %v395_v2 }
 0x10e   :  { %v212_v6 = vmax.f32 %v209_v5, 0.0 }
 0x110   :  { %501 = vmatmul.mubr.f32.vlgmr.msra.gmra.mxu1 %v212_v6 }
 0x1d0   :  { %v285_v11 = vpop.f32.mrf.mxu1 }
 0x1d1   :  { %v286_v12 = vadd.f32 %v397_v10, %v285_v11 }
 0x1d2   :  { %v502_v13 = vpop.f32.mrf.mxu1 }
 0x1d3   :  { %v289_v14 = vmax.f32 %v286_v12, 0.0 }
 0x1d5   :  { %536 = vmatmul.mubr.f32.vlgmr.msra.gmra.mxu0 %v289_v14 }
 0x295   :  { %v362_v16 = vpop.f32.mrf.mxu0 }
 0x296   :  { %v363_v17 = vadd.f32 %v398_v15, %v362_v16 }
 0x297   :  { %v537_v18 = vpop.f32.mrf.mxu0 }
 0x298   :  { %v367_v0 = vsel %vm366_vm1, %v363_v17, -inf }
 0x299   :  { %368 = vmax.xlane.f32.xlu0 %v367_v0 }
 0x322   :  { %v369_v19 = vpop.xlane.xlu0 %368 }
 0x323   :  { %v370_v20 = vsub.f32 %v363_v17, %v369_v19 }
 0x325   :  { %v371_v21 = vmul.f32 1.442695, %v370_v20 }
 0x327   :  { %548 = vpow2.f32 %v371_v21 }
 0x334   :  { %v549_v22 = vpop.eup %548 }
 0x335   :  { %v373_v23 = vsel %vm366_vm1, %v549_v22, 0.0 }
 0x336   :  { %374 = vadd.xlane.f32.xlu0 %v373_v23 }
 0x3bf   :  { %v375_v24 = vpop.xlane.xlu0 %374 }
 0x3c0   :  { %550 = vrcp.f32 %v375_v24 }
 0x3cd   :  { %v551_v25 = vpop.eup %550 }
 0x3ce   :  { %v377_v26 = vmul.f32 %v551_v25, %v549_v22 }
 0x3d0   :  { %378 = vst [vmem:[#allocation8] sm:$0x3] %v377_v26 }
 0x3d1   :  { %623 = shalt.err (!%p620_p5)
}
 0x3d2   :  { %388 = dma.vmem_to_hbm [thread:$0]  %s386_s12, 32, %s737_s4, [#allocation4]  }
 0x3d3   :  { %636 = dma.done.wait [#allocation4], 32  }
 0x3d4   :  { %637 = vsyncadd [#allocation4], 4294967264 }
 0x3d5   :  { %392 = vsyncpa [#allocation3], 1 }
 0x3d6   :  { %393 = vsyncpa [#allocation6], 1 }
 0x3d7   :  { %394 = vsyncpa [#allocation4], 1 }

</bundles_post_ra>
